<compile_context>
chip_gen: v5e
topology: v5e:2x2
jax: 0.10.0
libtpu: 0.0.40
codegen_flags: <defaults>
</compile_context>

<pallas_src>
import functools

import numpy as np
import jax
import jax.numpy as jnp
from jax.experimental import pallas as pl
from jax.experimental.pallas import tpu as pltpu

GLU_NUM = 2   # glunum hyper-parameter (fixed in the kernel signature)
MLP_NUM = 3   # len(mlp_layers)


def _round_up(x, m):
    return (x + m - 1) // m * m


def _nfm_kernel(emb_ref, xlin_ref,
                gw0_ref, gb0_ref, gw1_ref, gb1_ref,
                mw0_ref, mb0_ref, s0_ref, t0_ref,
                mw1_ref, mb1_ref, s1_ref, t1_ref,
                mw2_ref, mb2_ref, s2_ref, t2_ref,
                wo_ref, bo_ref,
                out_ref, *, n_f, E):
    FE = n_f * E
    emb = emb_ref[...]                                     # [TB, n_f*E] lane-packed fields

    # GenerateConv, lane-packed: products of the embedding tile with cyclic
    # lane rotations of itself.  Rotation by d*E covers all field pairs at
    # cyclic distance d; when n_f is even, d = n_f/2 yields every pair twice,
    # hence the 0.5 weight (duplicates are bit-identical, so this is exact).
    tiles = []
    for d in range(1, n_f // 2 + 1):
        w = 0.5 if (n_f % 2 == 0 and d == n_f // 2) else 1.0
        tiles.append((emb * pltpu.roll(emb, shift=d * E, axis=1), w))

    # GLU stack (glunum=2) with fused block-diagonal value|gate weights:
    # one [TB, FE] @ [FE, 2*FE] matmul per layer per tile; the value/gate
    # split at lane FE (=128) sits on a vreg boundary.
    glu = ((gw0_ref, gb0_ref), (gw1_ref, gb1_ref))
    outs = []
    for x, w in tiles:
        for gw, gb in glu:
            h = jnp.dot(x, gw[...], preferred_element_type=jnp.float32) + gb[...]
            x = h[:, :FE] * jax.nn.sigmoid(h[:, FE:])
        outs.append((x, w))

    # Weighted sum of the roll-tiles; the remaining sum over the n_f lane
    # groups (x_nfm = sum over pairs) is folded into mw0 (group-replicated).
    s = None
    for x, w in outs:
        term = x if w == 1.0 else x * w
        s = term if s is None else s + term

    # MLP: (Linear -> BatchNorm(eval, folded scale/shift) -> ReLU -> Dropout) x3
    # TODO(synk): Dropout is identity in eval mode; training-mode dropout RNG not implemented.
    h = jnp.dot(s, mw0_ref[...], preferred_element_type=jnp.float32) + mb0_ref[...]
    h = jnp.maximum(h * s0_ref[...] + t0_ref[...], 0.0)
    for mw, mb, sc, sh in ((mw1_ref, mb1_ref, s1_ref, t1_ref),
                           (mw2_ref, mb2_ref, s2_ref, t2_ref)):
        h = jnp.dot(h, mw[...], preferred_element_type=jnp.float32) + mb[...]
        h = jnp.maximum(h * sc[...] + sh[...], 0.0)

    # Output head (N=1): VPU multiply by the broadcast weight row + lane reduce
    # instead of an MXU matmul with a single live column.
    y = jnp.sum(h * wo_ref[...], axis=1, keepdims=True)    # [TB, 1]

    # FeaturesLinear (pre-reduced in the wrapper; its bias folded into bo).
    out_ref[...] = xlin_ref[...] + y + bo_ref[...]


def init_params(key, field_dims, embed_dim, mlp_layers):
    assert len(mlp_layers) == MLP_NUM
    n_feat = int(sum(field_dims))
    ks = list(jax.random.split(key, 8 + 6 * MLP_NUM))
    p = {}
    p["emb_table"] = 0.1 * jax.random.normal(ks[0], (n_feat, embed_dim), jnp.float32)
    p["lin_table"] = 0.1 * jax.random.normal(ks[1], (n_feat, 1), jnp.float32)
    p["lin_bias"] = 0.05 * jax.random.normal(ks[2], (1, 1), jnp.float32)
    p["glu_w"] = [0.2 * jax.random.normal(ks[3 + i], (embed_dim, 2 * embed_dim), jnp.float32)
                  for i in range(GLU_NUM)]
    p["glu_b"] = [0.05 * jax.random.normal(ks[5 + i], (1, 2 * embed_dim), jnp.float32)
                  for i in range(GLU_NUM)]
    dims = (embed_dim,) + tuple(mlp_layers)
    p["mlp_w"], p["mlp_b"] = [], []
    p["bn_gamma"], p["bn_beta"], p["bn_mean"], p["bn_var"] = [], [], [], []
    base = 7
    for i, (din, dout) in enumerate(zip(dims[:-1], dims[1:])):
        kw, kb, kg, kbe, km, kv = jax.random.split(ks[base + i], 6)
        p["mlp_w"].append(jax.random.normal(kw, (din, dout), jnp.float32) / np.sqrt(din))
        p["mlp_b"].append(0.05 * jax.random.normal(kb, (1, dout), jnp.float32))
        p["bn_gamma"].append(1.0 + 0.1 * jax.random.normal(kg, (dout,), jnp.float32))
        p["bn_beta"].append(0.1 * jax.random.normal(kbe, (dout,), jnp.float32))
        p["bn_mean"].append(0.1 * jax.random.normal(km, (dout,), jnp.float32))
        p["bn_var"].append(1.0 + 0.5 * jax.random.uniform(kv, (dout,), jnp.float32))
    p["out_w"] = jax.random.normal(ks[base + MLP_NUM], (dims[-1], 1), jnp.float32) / np.sqrt(dims[-1])
    p["out_b"] = 0.05 * jax.random.normal(ks[base + MLP_NUM + 1], (1, 1), jnp.float32)
    return p


def nfm_inter_gate_forward(x_idx, params, field_dims, embed_dim, tile_b=512):
    """x_idx: [B, n_f] int token ids (one per field). Returns [B, 1] float32."""
    B, n_f = x_idx.shape
    E = embed_dim
    FE = n_f * E

    # --- glue: offsets + embedding gather (plain JAX), lane-dense layout ---
    offsets = jnp.asarray(np.concatenate(([0], np.cumsum(field_dims)[:-1])).astype(np.int32))
    idx = x_idx.astype(jnp.int32) + offsets[None, :]               # [B, n_f]
    emb = params["emb_table"][idx].reshape(B, FE)                  # [B, n_f*E] fields on lanes
    # FeaturesLinear reduced to a [B, 1] vector (bias folded into out_b below).
    x_lin = jnp.sum(params["lin_table"][idx][..., 0], axis=1, keepdims=True)   # [B, 1]

    # --- batch tiling: big tiles to amortize per-step overhead, but keep the
    # grid at >= 2 tiles when possible so v7x's two TensorCores both work ---
    half_b = max(8, (_round_up(B, 8) // 2) // 8 * 8)
    TB = min(tile_b, half_b)
    Bp = _round_up(B, TB)
    if Bp != B:
        emb = jnp.pad(emb, ((0, Bp - B), (0, 0)))
        x_lin = jnp.pad(x_lin, ((0, Bp - B), (0, 0)))
    n_tiles = Bp // TB

    # --- glue: fold eval-mode BatchNorm into per-feature scale/shift ---
    eps = 1e-5
    bn_scale_1d = [g / jnp.sqrt(v + eps) for g, v in zip(params["bn_gamma"], params["bn_var"])]
    bn_shift_1d = [b - m * s for b, m, s in zip(params["bn_beta"], params["bn_mean"], bn_scale_1d)]
    bn_scale = [s.reshape(1, -1) for s in bn_scale_1d]
    bn_shift = [t.reshape(1, -1) for t in bn_shift_1d]

    # --- glue: fused block-diagonal GLU weights [FE, 2*FE] (value half | gate half) ---
    eye = jnp.eye(n_f, dtype=jnp.float32)
    glu_ops = []
    for w, b in zip(params["glu_w"], params["glu_b"]):
        wa, wg = w[:, :E], w[:, E:]
        ba, bg = b[:, :E], b[:, E:]
        wf = jnp.concatenate([jnp.kron(eye, wa), jnp.kron(eye, wg)], axis=1)          # [FE, 2*FE]
        bf = jnp.concatenate([jnp.tile(ba, (1, n_f)), jnp.tile(bg, (1, n_f))], axis=1)  # [1, 2*FE]
        glu_ops += [wf, bf]

    # --- glue: replicate mlp_w0 over lane groups -> folds the pair-sum into the matmul ---
    mw0e = jnp.tile(params["mlp_w"][0], (n_f, 1))                  # [FE, d0]

    wo_row = params["out_w"].reshape(1, -1)                        # [1, d_last]
    out_b = params["out_b"] + params["lin_bias"]                   # fold FeaturesLinear bias

    operands = [emb, x_lin] + glu_ops
    operands += [mw0e, params["mlp_b"][0], bn_scale[0], bn_shift[0]]
    for i in range(1, MLP_NUM):
        operands += [params["mlp_w"][i], params["mlp_b"][i], bn_scale[i], bn_shift[i]]
    operands += [wo_row, out_b]

    def _full_spec(arr):
        return pl.BlockSpec(arr.shape, lambda i: (0,) * arr.ndim)

    in_specs = [
        pl.BlockSpec((TB, FE), lambda i: (i, 0)),   # emb: lane-dense, tiled over batch
        pl.BlockSpec((TB, 1), lambda i: (i, 0)),    # x_lin: tiled over batch
    ] + [_full_spec(op) for op in operands[2:]]     # weights: VMEM-resident

    out_specs = pl.BlockSpec((TB, 1), lambda i: (i, 0))

    kernel = functools.partial(_nfm_kernel, n_f=n_f, E=E)
    out = pl.pallas_call(
        kernel,
        out_shape=jax.ShapeDtypeStruct((Bp, 1), jnp.float32),
        grid=(n_tiles,),
        in_specs=in_specs,
        out_specs=out_specs,
        compiler_params=pltpu.CompilerParams(dimension_semantics=("parallel",)),
    )(*operands)
    return out[:B]


def nfm_ref(x_idx, params, field_dims, embed_dim):
    """Pure-JAX reference of the PyTorch forward (eval mode)."""
    B, n_f = x_idx.shape
    E = embed_dim
    offsets = jnp.asarray(np.concatenate(([0], np.cumsum(field_dims)[:-1])).astype(np.int32))
    idx = x_idx.astype(jnp.int32) + offsets[None, :]
    emb = params["emb_table"][idx]
    lin = params["lin_table"][idx][..., 0]
    x_lin = jnp.sum(lin, axis=1, keepdims=True) + params["lin_bias"]
    row, col = np.triu_indices(n_f, k=1)
    x = emb[:, row, :] * emb[:, col, :]                       # GenerateConv -> [B, P, E]
    for w, b in zip(params["glu_w"], params["glu_b"]):
        h = jnp.einsum("bpe,ef->bpf", x, w) + b[None]
        x = h[..., :E] * jax.nn.sigmoid(h[..., E:])
    h = jnp.sum(x, axis=1)                                    # x_nfm
    eps = 1e-5
    for w, b, g, be, m, v in zip(params["mlp_w"], params["mlp_b"],
                                 params["bn_gamma"], params["bn_beta"],
                                 params["bn_mean"], params["bn_var"]):
        h = h @ w + b
        h = (h - m) / jnp.sqrt(v + eps) * g + be
        h = jnp.maximum(h, 0.0)
    y = h @ params["out_w"] + params["out_b"]
    return x_lin + y


if __name__ == "__main__":
    field_dims = (8, 8, 8, 8)     # n_f = 4 fields  -> n_f * E = 128 lanes (one vreg)
    embed_dim = 32
    mlp_layers = (64, 64, 64)
    B = 20                        # small, deliberately not a multiple of the tile

    params = init_params(jax.random.PRNGKey(0), field_dims, embed_dim, mlp_layers)

    kx = jax.random.PRNGKey(0)
    cols = []
    for fd in field_dims:
        kx, kf = jax.random.split(kx)
        cols.append(jax.random.randint(kf, (B, 1), 0, fd, dtype=jnp.int32))
    x_idx = jnp.concatenate(cols, axis=1)                     # [B, n_f] token ids

    # TB auto-caps to 8 here (keeps >= 2 grid tiles), so the demo exercises
    # multi-step batch tiling + padding; production batches use tile_b=512.
    out = jax.block_until_ready(
        nfm_inter_gate_forward(x_idx, params, field_dims, embed_dim))
    ref = jax.block_until_ready(nfm_ref(x_idx, params, field_dims, embed_dim))

    assert out.shape == (B, 1), out.shape
    if not bool(jnp.allclose(out, ref, atol=1e-4, rtol=1e-4)):
        raise AssertionError(
            f"mismatch vs reference: max abs err = {float(jnp.max(jnp.abs(out - ref)))}")
    print("KERNEL_OK")
</pallas_src>

<mosaic_0001>
module attributes {stable_mosaic.version = 11 : i64} {
  func.func @_nfm_kernel(%arg0: i32, %arg1: memref<8x128xf32, #tpu.memory_space<vmem>>, %arg2: memref<8x1xf32, #tpu.memory_space<vmem>>, %arg3: memref<128x256xf32, #tpu.memory_space<vmem>>, %arg4: memref<1x256xf32, #tpu.memory_space<vmem>>, %arg5: memref<128x256xf32, #tpu.memory_space<vmem>>, %arg6: memref<1x256xf32, #tpu.memory_space<vmem>>, %arg7: memref<128x64xf32, #tpu.memory_space<vmem>>, %arg8: memref<1x64xf32, #tpu.memory_space<vmem>>, %arg9: memref<1x64xf32, #tpu.memory_space<vmem>>, %arg10: memref<1x64xf32, #tpu.memory_space<vmem>>, %arg11: memref<64x64xf32, #tpu.memory_space<vmem>>, %arg12: memref<1x64xf32, #tpu.memory_space<vmem>>, %arg13: memref<1x64xf32, #tpu.memory_space<vmem>>, %arg14: memref<1x64xf32, #tpu.memory_space<vmem>>, %arg15: memref<64x64xf32, #tpu.memory_space<vmem>>, %arg16: memref<1x64xf32, #tpu.memory_space<vmem>>, %arg17: memref<1x64xf32, #tpu.memory_space<vmem>>, %arg18: memref<1x64xf32, #tpu.memory_space<vmem>>, %arg19: memref<1x64xf32, #tpu.memory_space<vmem>>, %arg20: memref<1x1xf32, #tpu.memory_space<vmem>>, %arg21: memref<8x1xf32, #tpu.memory_space<vmem>>) attributes {dimension_semantics = [#tpu.dimension_semantics<parallel>], iteration_bounds = array<i64: 3>, scalar_prefetch = 0 : i64, scratch_operands = 0 : i64, tpu.core_type = #tpu.core_type<tc>, window_params = [{transform_indices = @transform_0, window_bounds = array<i64: 8, 128>}, {transform_indices = @transform_1, window_bounds = array<i64: 8, 1>}, {pipeline_mode = #tpu.pipeline_mode<synchronous>, transform_indices = @transform_2, window_bounds = array<i64: 128, 256>}, {pipeline_mode = #tpu.pipeline_mode<synchronous>, transform_indices = @transform_3, window_bounds = array<i64: 1, 256>}, {pipeline_mode = #tpu.pipeline_mode<synchronous>, transform_indices = @transform_4, window_bounds = array<i64: 128, 256>}, {pipeline_mode = #tpu.pipeline_mode<synchronous>, transform_indices = @transform_5, window_bounds = array<i64: 1, 256>}, {pipeline_mode = #tpu.pipeline_mode<synchronous>, transform_indices = @transform_6, window_bounds = array<i64: 128, 64>}, {pipeline_mode = #tpu.pipeline_mode<synchronous>, transform_indices = @transform_7, window_bounds = array<i64: 1, 64>}, {pipeline_mode = #tpu.pipeline_mode<synchronous>, transform_indices = @transform_8, window_bounds = array<i64: 1, 64>}, {pipeline_mode = #tpu.pipeline_mode<synchronous>, transform_indices = @transform_9, window_bounds = array<i64: 1, 64>}, {pipeline_mode = #tpu.pipeline_mode<synchronous>, transform_indices = @transform_10, window_bounds = array<i64: 64, 64>}, {pipeline_mode = #tpu.pipeline_mode<synchronous>, transform_indices = @transform_11, window_bounds = array<i64: 1, 64>}, {pipeline_mode = #tpu.pipeline_mode<synchronous>, transform_indices = @transform_12, window_bounds = array<i64: 1, 64>}, {pipeline_mode = #tpu.pipeline_mode<synchronous>, transform_indices = @transform_13, window_bounds = array<i64: 1, 64>}, {pipeline_mode = #tpu.pipeline_mode<synchronous>, transform_indices = @transform_14, window_bounds = array<i64: 64, 64>}, {pipeline_mode = #tpu.pipeline_mode<synchronous>, transform_indices = @transform_15, window_bounds = array<i64: 1, 64>}, {pipeline_mode = #tpu.pipeline_mode<synchronous>, transform_indices = @transform_16, window_bounds = array<i64: 1, 64>}, {pipeline_mode = #tpu.pipeline_mode<synchronous>, transform_indices = @transform_17, window_bounds = array<i64: 1, 64>}, {pipeline_mode = #tpu.pipeline_mode<synchronous>, transform_indices = @transform_18, window_bounds = array<i64: 1, 64>}, {pipeline_mode = #tpu.pipeline_mode<synchronous>, transform_indices = @transform_19, window_bounds = array<i64: 1, 1>}, {transform_indices = @transform_20, window_bounds = array<i64: 8, 1>}]} {
    %c0 = arith.constant 0 : index
    %c0_0 = arith.constant 0 : index
    %0 = vector.load %arg1[%c0, %c0_0] : memref<8x128xf32, #tpu.memory_space<vmem>>, vector<8x128xf32>
    %c32_i32 = arith.constant 32 : i32
    %1 = tpu.dynamic_rotate %0 by %c32_i32 dim 1 : vector<8x128xf32>, i32 -> vector<8x128xf32>
    %2 = arith.mulf %0, %1 : vector<8x128xf32>
    %c64_i32 = arith.constant 64 : i32
    %3 = tpu.dynamic_rotate %0 by %c64_i32 dim 1 : vector<8x128xf32>, i32 -> vector<8x128xf32>
    %4 = arith.mulf %0, %3 : vector<8x128xf32>
    %c0_1 = arith.constant 0 : index
    %c0_2 = arith.constant 0 : index
    %5 = vector.load %arg3[%c0_1, %c0_2] : memref<128x256xf32, #tpu.memory_space<vmem>>, vector<128x256xf32>
    %cst = arith.constant dense<0.000000e+00> : vector<8x256xf32>
    %6 = tpu.matmul %2, %5, %cst {dimension_numbers = #tpu.dot_dimension_numbers<[1], [0], [0], [1], [0, 0, 1, 1], [], []>} : vector<8x128xf32>, vector<128x256xf32>, vector<8x256xf32> -> vector<8x256xf32>
    %c0_3 = arith.constant 0 : index
    %c0_4 = arith.constant 0 : index
    %7 = vector.load %arg4[%c0_3, %c0_4] : memref<1x256xf32, #tpu.memory_space<vmem>>, vector<1x256xf32>
    %8 = vector.broadcast %7 : vector<1x256xf32> to vector<8x256xf32>
    %9 = arith.addf %6, %8 : vector<8x256xf32>
    %10 = vector.extract_strided_slice %9 {offsets = [0, 0], sizes = [8, 128], strides = [1, 1]} : vector<8x256xf32> to vector<8x128xf32>
    %11 = vector.extract_strided_slice %9 {offsets = [0, 128], sizes = [8, 128], strides = [1, 1]} : vector<8x256xf32> to vector<8x128xf32>
    %12 = arith.negf %11 : vector<8x128xf32>
    %13 = math.exp %12 : vector<8x128xf32>
    %cst_5 = arith.constant 1.000000e+00 : f32
    %14 = vector.broadcast %cst_5 : f32 to vector<8x128xf32>
    %15 = arith.addf %14, %13 : vector<8x128xf32>
    %16 = arith.divf %14, %15 : vector<8x128xf32>
    %17 = arith.mulf %10, %16 : vector<8x128xf32>
    %c0_6 = arith.constant 0 : index
    %c0_7 = arith.constant 0 : index
    %18 = vector.load %arg5[%c0_6, %c0_7] : memref<128x256xf32, #tpu.memory_space<vmem>>, vector<128x256xf32>
    %cst_8 = arith.constant dense<0.000000e+00> : vector<8x256xf32>
    %19 = tpu.matmul %17, %18, %cst_8 {dimension_numbers = #tpu.dot_dimension_numbers<[1], [0], [0], [1], [0, 0, 1, 1], [], []>} : vector<8x128xf32>, vector<128x256xf32>, vector<8x256xf32> -> vector<8x256xf32>
    %c0_9 = arith.constant 0 : index
    %c0_10 = arith.constant 0 : index
    %20 = vector.load %arg6[%c0_9, %c0_10] : memref<1x256xf32, #tpu.memory_space<vmem>>, vector<1x256xf32>
    %21 = vector.broadcast %20 : vector<1x256xf32> to vector<8x256xf32>
    %22 = arith.addf %19, %21 : vector<8x256xf32>
    %23 = vector.extract_strided_slice %22 {offsets = [0, 0], sizes = [8, 128], strides = [1, 1]} : vector<8x256xf32> to vector<8x128xf32>
    %24 = vector.extract_strided_slice %22 {offsets = [0, 128], sizes = [8, 128], strides = [1, 1]} : vector<8x256xf32> to vector<8x128xf32>
    %25 = arith.negf %24 : vector<8x128xf32>
    %26 = math.exp %25 : vector<8x128xf32>
    %cst_11 = arith.constant 1.000000e+00 : f32
    %27 = vector.broadcast %cst_11 : f32 to vector<8x128xf32>
    %28 = arith.addf %27, %26 : vector<8x128xf32>
    %29 = arith.divf %27, %28 : vector<8x128xf32>
    %30 = arith.mulf %23, %29 : vector<8x128xf32>
    %c0_12 = arith.constant 0 : index
    %c0_13 = arith.constant 0 : index
    %31 = vector.load %arg3[%c0_12, %c0_13] : memref<128x256xf32, #tpu.memory_space<vmem>>, vector<128x256xf32>
    %cst_14 = arith.constant dense<0.000000e+00> : vector<8x256xf32>
    %32 = tpu.matmul %4, %31, %cst_14 {dimension_numbers = #tpu.dot_dimension_numbers<[1], [0], [0], [1], [0, 0, 1, 1], [], []>} : vector<8x128xf32>, vector<128x256xf32>, vector<8x256xf32> -> vector<8x256xf32>
    %c0_15 = arith.constant 0 : index
    %c0_16 = arith.constant 0 : index
    %33 = vector.load %arg4[%c0_15, %c0_16] : memref<1x256xf32, #tpu.memory_space<vmem>>, vector<1x256xf32>
    %34 = vector.broadcast %33 : vector<1x256xf32> to vector<8x256xf32>
    %35 = arith.addf %32, %34 : vector<8x256xf32>
    %36 = vector.extract_strided_slice %35 {offsets = [0, 0], sizes = [8, 128], strides = [1, 1]} : vector<8x256xf32> to vector<8x128xf32>
    %37 = vector.extract_strided_slice %35 {offsets = [0, 128], sizes = [8, 128], strides = [1, 1]} : vector<8x256xf32> to vector<8x128xf32>
    %38 = arith.negf %37 : vector<8x128xf32>
    %39 = math.exp %38 : vector<8x128xf32>
    %cst_17 = arith.constant 1.000000e+00 : f32
    %40 = vector.broadcast %cst_17 : f32 to vector<8x128xf32>
    %41 = arith.addf %40, %39 : vector<8x128xf32>
    %42 = arith.divf %40, %41 : vector<8x128xf32>
    %43 = arith.mulf %36, %42 : vector<8x128xf32>
    %c0_18 = arith.constant 0 : index
    %c0_19 = arith.constant 0 : index
    %44 = vector.load %arg5[%c0_18, %c0_19] : memref<128x256xf32, #tpu.memory_space<vmem>>, vector<128x256xf32>
    %cst_20 = arith.constant dense<0.000000e+00> : vector<8x256xf32>
    %45 = tpu.matmul %43, %44, %cst_20 {dimension_numbers = #tpu.dot_dimension_numbers<[1], [0], [0], [1], [0, 0, 1, 1], [], []>} : vector<8x128xf32>, vector<128x256xf32>, vector<8x256xf32> -> vector<8x256xf32>
    %c0_21 = arith.constant 0 : index
    %c0_22 = arith.constant 0 : index
    %46 = vector.load %arg6[%c0_21, %c0_22] : memref<1x256xf32, #tpu.memory_space<vmem>>, vector<1x256xf32>
    %47 = vector.broadcast %46 : vector<1x256xf32> to vector<8x256xf32>
    %48 = arith.addf %45, %47 : vector<8x256xf32>
    %49 = vector.extract_strided_slice %48 {offsets = [0, 0], sizes = [8, 128], strides = [1, 1]} : vector<8x256xf32> to vector<8x128xf32>
    %50 = vector.extract_strided_slice %48 {offsets = [0, 128], sizes = [8, 128], strides = [1, 1]} : vector<8x256xf32> to vector<8x128xf32>
    %51 = arith.negf %50 : vector<8x128xf32>
    %52 = math.exp %51 : vector<8x128xf32>
    %cst_23 = arith.constant 1.000000e+00 : f32
    %53 = vector.broadcast %cst_23 : f32 to vector<8x128xf32>
    %54 = arith.addf %53, %52 : vector<8x128xf32>
    %55 = arith.divf %53, %54 : vector<8x128xf32>
    %56 = arith.mulf %49, %55 : vector<8x128xf32>
    %cst_24 = arith.constant 5.000000e-01 : f32
    %57 = vector.broadcast %cst_24 : f32 to vector<8x128xf32>
    %58 = arith.mulf %56, %57 : vector<8x128xf32>
    %59 = arith.addf %30, %58 : vector<8x128xf32>
    %c0_25 = arith.constant 0 : index
    %c0_26 = arith.constant 0 : index
    %60 = vector.load %arg7[%c0_25, %c0_26] : memref<128x64xf32, #tpu.memory_space<vmem>>, vector<128x64xf32>
    %cst_27 = arith.constant dense<0.000000e+00> : vector<8x64xf32>
    %61 = tpu.matmul %59, %60, %cst_27 {dimension_numbers = #tpu.dot_dimension_numbers<[1], [0], [0], [1], [0, 0, 1, 1], [], []>} : vector<8x128xf32>, vector<128x64xf32>, vector<8x64xf32> -> vector<8x64xf32>
    %c0_28 = arith.constant 0 : index
    %c0_29 = arith.constant 0 : index
    %62 = vector.load %arg8[%c0_28, %c0_29] : memref<1x64xf32, #tpu.memory_space<vmem>>, vector<1x64xf32>
    %63 = vector.broadcast %62 : vector<1x64xf32> to vector<8x64xf32>
    %64 = arith.addf %61, %63 : vector<8x64xf32>
    %c0_30 = arith.constant 0 : index
    %c0_31 = arith.constant 0 : index
    %65 = vector.load %arg9[%c0_30, %c0_31] : memref<1x64xf32, #tpu.memory_space<vmem>>, vector<1x64xf32>
    %66 = vector.broadcast %65 : vector<1x64xf32> to vector<8x64xf32>
    %67 = arith.mulf %64, %66 : vector<8x64xf32>
    %c0_32 = arith.constant 0 : index
    %c0_33 = arith.constant 0 : index
    %68 = vector.load %arg10[%c0_32, %c0_33] : memref<1x64xf32, #tpu.memory_space<vmem>>, vector<1x64xf32>
    %69 = vector.broadcast %68 : vector<1x64xf32> to vector<8x64xf32>
    %70 = arith.addf %67, %69 : vector<8x64xf32>
    %cst_34 = arith.constant 0.000000e+00 : f32
    %71 = vector.broadcast %cst_34 : f32 to vector<8x64xf32>
    %72 = arith.maximumf %70, %71 : vector<8x64xf32>
    %c0_35 = arith.constant 0 : index
    %c0_36 = arith.constant 0 : index
    %73 = vector.load %arg11[%c0_35, %c0_36] : memref<64x64xf32, #tpu.memory_space<vmem>>, vector<64x64xf32>
    %cst_37 = arith.constant dense<0.000000e+00> : vector<8x64xf32>
    %74 = tpu.matmul %72, %73, %cst_37 {dimension_numbers = #tpu.dot_dimension_numbers<[1], [0], [0], [1], [0, 0, 1, 1], [], []>} : vector<8x64xf32>, vector<64x64xf32>, vector<8x64xf32> -> vector<8x64xf32>
    %c0_38 = arith.constant 0 : index
    %c0_39 = arith.constant 0 : index
    %75 = vector.load %arg12[%c0_38, %c0_39] : memref<1x64xf32, #tpu.memory_space<vmem>>, vector<1x64xf32>
    %76 = vector.broadcast %75 : vector<1x64xf32> to vector<8x64xf32>
    %77 = arith.addf %74, %76 : vector<8x64xf32>
    %c0_40 = arith.constant 0 : index
    %c0_41 = arith.constant 0 : index
    %78 = vector.load %arg13[%c0_40, %c0_41] : memref<1x64xf32, #tpu.memory_space<vmem>>, vector<1x64xf32>
    %79 = vector.broadcast %78 : vector<1x64xf32> to vector<8x64xf32>
    %80 = arith.mulf %77, %79 : vector<8x64xf32>
    %c0_42 = arith.constant 0 : index
    %c0_43 = arith.constant 0 : index
    %81 = vector.load %arg14[%c0_42, %c0_43] : memref<1x64xf32, #tpu.memory_space<vmem>>, vector<1x64xf32>
    %82 = vector.broadcast %81 : vector<1x64xf32> to vector<8x64xf32>
    %83 = arith.addf %80, %82 : vector<8x64xf32>
    %cst_44 = arith.constant 0.000000e+00 : f32
    %84 = vector.broadcast %cst_44 : f32 to vector<8x64xf32>
    %85 = arith.maximumf %83, %84 : vector<8x64xf32>
    %c0_45 = arith.constant 0 : index
    %c0_46 = arith.constant 0 : index
    %86 = vector.load %arg15[%c0_45, %c0_46] : memref<64x64xf32, #tpu.memory_space<vmem>>, vector<64x64xf32>
    %cst_47 = arith.constant dense<0.000000e+00> : vector<8x64xf32>
    %87 = tpu.matmul %85, %86, %cst_47 {dimension_numbers = #tpu.dot_dimension_numbers<[1], [0], [0], [1], [0, 0, 1, 1], [], []>} : vector<8x64xf32>, vector<64x64xf32>, vector<8x64xf32> -> vector<8x64xf32>
    %c0_48 = arith.constant 0 : index
    %c0_49 = arith.constant 0 : index
    %88 = vector.load %arg16[%c0_48, %c0_49] : memref<1x64xf32, #tpu.memory_space<vmem>>, vector<1x64xf32>
    %89 = vector.broadcast %88 : vector<1x64xf32> to vector<8x64xf32>
    %90 = arith.addf %87, %89 : vector<8x64xf32>
    %c0_50 = arith.constant 0 : index
    %c0_51 = arith.constant 0 : index
    %91 = vector.load %arg17[%c0_50, %c0_51] : memref<1x64xf32, #tpu.memory_space<vmem>>, vector<1x64xf32>
    %92 = vector.broadcast %91 : vector<1x64xf32> to vector<8x64xf32>
    %93 = arith.mulf %90, %92 : vector<8x64xf32>
    %c0_52 = arith.constant 0 : index
    %c0_53 = arith.constant 0 : index
    %94 = vector.load %arg18[%c0_52, %c0_53] : memref<1x64xf32, #tpu.memory_space<vmem>>, vector<1x64xf32>
    %95 = vector.broadcast %94 : vector<1x64xf32> to vector<8x64xf32>
    %96 = arith.addf %93, %95 : vector<8x64xf32>
    %cst_54 = arith.constant 0.000000e+00 : f32
    %97 = vector.broadcast %cst_54 : f32 to vector<8x64xf32>
    %98 = arith.maximumf %96, %97 : vector<8x64xf32>
    %c0_55 = arith.constant 0 : index
    %c0_56 = arith.constant 0 : index
    %99 = vector.load %arg19[%c0_55, %c0_56] : memref<1x64xf32, #tpu.memory_space<vmem>>, vector<1x64xf32>
    %100 = vector.broadcast %99 : vector<1x64xf32> to vector<8x64xf32>
    %101 = arith.mulf %98, %100 : vector<8x64xf32>
    %cst_57 = arith.constant dense<0.000000e+00> : vector<8xf32>
    %102 = vector.multi_reduction <add>, %101, %cst_57 [1] : vector<8x64xf32> to vector<8xf32>
    %103 = vector.shape_cast %102 : vector<8xf32> to vector<8x1xf32>
    %c0_58 = arith.constant 0 : index
    %c0_59 = arith.constant 0 : index
    %104 = vector.load %arg2[%c0_58, %c0_59] : memref<8x1xf32, #tpu.memory_space<vmem>>, vector<8x1xf32>
    %105 = arith.addf %104, %103 : vector<8x1xf32>
    %c0_60 = arith.constant 0 : index
    %c0_61 = arith.constant 0 : index
    %106 = vector.load %arg20[%c0_60, %c0_61] : memref<1x1xf32, #tpu.memory_space<vmem>>, vector<1x1xf32>
    %107 = vector.broadcast %106 : vector<1x1xf32> to vector<8x1xf32>
    %108 = arith.addf %105, %107 : vector<8x1xf32>
    %c0_62 = arith.constant 0 : index
    %c0_63 = arith.constant 0 : index
    %109 = vector.load %arg21[%c0_62, %c0_63] : memref<8x1xf32, #tpu.memory_space<vmem>>, vector<8x1xf32>
    tpu.vector_store %arg21[%c0_62, %c0_63], %108 {strides = array<i32>} : memref<8x1xf32, #tpu.memory_space<vmem>>, vector<8x1xf32>,
    return
  }
  func.func @transform_0(%arg0: i32) -> (i32, i32) {
    %c0_i32 = arith.constant 0 : i32
    %c0_i32_0 = arith.constant 0 : i32
    return %arg0, %c0_i32 : i32, i32
  }
  func.func @transform_1(%arg0: i32) -> (i32, i32) {
    %c0_i32 = arith.constant 0 : i32
    %c0_i32_0 = arith.constant 0 : i32
    return %arg0, %c0_i32 : i32, i32
  }
  func.func @transform_2(%arg0: i32) -> (i32, i32) {
    %c0_i32 = arith.constant 0 : i32
    %c0_i32_0 = arith.constant 0 : i32
    %c0_i32_1 = arith.constant 0 : i32
    return %c0_i32, %c0_i32_0 : i32, i32
  }
  func.func @transform_3(%arg0: i32) -> (i32, i32) {
    %c0_i32 = arith.constant 0 : i32
    %c0_i32_0 = arith.constant 0 : i32
    %c0_i32_1 = arith.constant 0 : i32
    return %c0_i32, %c0_i32_0 : i32, i32
  }
  func.func @transform_4(%arg0: i32) -> (i32, i32) {
    %c0_i32 = arith.constant 0 : i32
    %c0_i32_0 = arith.constant 0 : i32
    %c0_i32_1 = arith.constant 0 : i32
    return %c0_i32, %c0_i32_0 : i32, i32
  }
  func.func @transform_5(%arg0: i32) -> (i32, i32) {
    %c0_i32 = arith.constant 0 : i32
    %c0_i32_0 = arith.constant 0 : i32
    %c0_i32_1 = arith.constant 0 : i32
    return %c0_i32, %c0_i32_0 : i32, i32
  }
  func.func @transform_6(%arg0: i32) -> (i32, i32) {
    %c0_i32 = arith.constant 0 : i32
    %c0_i32_0 = arith.constant 0 : i32
    %c0_i32_1 = arith.constant 0 : i32
    return %c0_i32, %c0_i32_0 : i32, i32
  }
  func.func @transform_7(%arg0: i32) -> (i32, i32) {
    %c0_i32 = arith.constant 0 : i32
    %c0_i32_0 = arith.constant 0 : i32
    %c0_i32_1 = arith.constant 0 : i32
    return %c0_i32, %c0_i32_0 : i32, i32
  }
  func.func @transform_8(%arg0: i32) -> (i32, i32) {
    %c0_i32 = arith.constant 0 : i32
    %c0_i32_0 = arith.constant 0 : i32
    %c0_i32_1 = arith.constant 0 : i32
    return %c0_i32, %c0_i32_0 : i32, i32
  }
  func.func @transform_9(%arg0: i32) -> (i32, i32) {
    %c0_i32 = arith.constant 0 : i32
    %c0_i32_0 = arith.constant 0 : i32
    %c0_i32_1 = arith.constant 0 : i32
    return %c0_i32, %c0_i32_0 : i32, i32
  }
  func.func @transform_10(%arg0: i32) -> (i32, i32) {
    %c0_i32 = arith.constant 0 : i32
    %c0_i32_0 = arith.constant 0 : i32
    %c0_i32_1 = arith.constant 0 : i32
    return %c0_i32, %c0_i32_0 : i32, i32
  }
  func.func @transform_11(%arg0: i32) -> (i32, i32) {
    %c0_i32 = arith.constant 0 : i32
    %c0_i32_0 = arith.constant 0 : i32
    %c0_i32_1 = arith.constant 0 : i32
    return %c0_i32, %c0_i32_0 : i32, i32
  }
  func.func @transform_12(%arg0: i32) -> (i32, i32) {
    %c0_i32 = arith.constant 0 : i32
    %c0_i32_0 = arith.constant 0 : i32
    %c0_i32_1 = arith.constant 0 : i32
    return %c0_i32, %c0_i32_0 : i32, i32
  }
  func.func @transform_13(%arg0: i32) -> (i32, i32) {
    %c0_i32 = arith.constant 0 : i32
    %c0_i32_0 = arith.constant 0 : i32
    %c0_i32_1 = arith.constant 0 : i32
    return %c0_i32, %c0_i32_0 : i32, i32
  }
  func.func @transform_14(%arg0: i32) -> (i32, i32) {
    %c0_i32 = arith.constant 0 : i32
    %c0_i32_0 = arith.constant 0 : i32
    %c0_i32_1 = arith.constant 0 : i32
    return %c0_i32, %c0_i32_0 : i32, i32
  }
  func.func @transform_15(%arg0: i32) -> (i32, i32) {
    %c0_i32 = arith.constant 0 : i32
    %c0_i32_0 = arith.constant 0 : i32
    %c0_i32_1 = arith.constant 0 : i32
    return %c0_i32, %c0_i32_0 : i32, i32
  }
  func.func @transform_16(%arg0: i32) -> (i32, i32) {
    %c0_i32 = arith.constant 0 : i32
    %c0_i32_0 = arith.constant 0 : i32
    %c0_i32_1 = arith.constant 0 : i32
    return %c0_i32, %c0_i32_0 : i32, i32
  }
  func.func @transform_17(%arg0: i32) -> (i32, i32) {
    %c0_i32 = arith.constant 0 : i32
    %c0_i32_0 = arith.constant 0 : i32
    %c0_i32_1 = arith.constant 0 : i32
    return %c0_i32, %c0_i32_0 : i32, i32
  }
  func.func @transform_18(%arg0: i32) -> (i32, i32) {
    %c0_i32 = arith.constant 0 : i32
    %c0_i32_0 = arith.constant 0 : i32
    %c0_i32_1 = arith.constant 0 : i32
    return %c0_i32, %c0_i32_0 : i32, i32
  }
  func.func @transform_19(%arg0: i32) -> (i32, i32) {
    %c0_i32 = arith.constant 0 : i32
    %c0_i32_0 = arith.constant 0 : i32
    %c0_i32_1 = arith.constant 0 : i32
    return %c0_i32, %c0_i32_0 : i32, i32
  }
  func.func @transform_20(%arg0: i32) -> (i32, i32) {
    %c0_i32 = arith.constant 0 : i32
    %c0_i32_0 = arith.constant 0 : i32
    return %arg0, %c0_i32 : i32, i32
  }
}

</mosaic_0001>

<bundles_post_ra>
// kernel: tpu_custom_call.1
= control target key start
LH: loop header
LB: loop body
LE: loop exit
PB: predicated region body
PF: predicated region fallthrough
CT: control target
= control target key end

     0   :  { %s1782_s0 = inlined_call_operand.vmem [shape: f32[24,128], index: 0, kind: input, shape index: {}]   ;;  %s1783_s1 = inlined_call_operand.vmem [shape: f32[24,1], index: 1, kind: input, shape index: {}]   ;;  %s1784_s2 = inlined_call_operand.hbm [shape: f32[128,256], index: 2, kind: input, shape index: {}]   ;;  %s1785_s3 = inlined_call_operand.vmem [shape: f32[1,256], index: 3, kind: input, shape index: {}]   ;;  %s1786_s4 = inlined_call_operand.hbm [shape: f32[128,256], index: 4, kind: input, shape index: {}]   ;;  %s1787_s5 = inlined_call_operand.vmem [shape: f32[1,256], index: 5, kind: input, shape index: {}]   ;;  %s1788_s6 = inlined_call_operand.vmem [shape: f32[128,64], index: 6, kind: input, shape index: {}]   ;;  %s1789_s7 = inlined_call_operand.vmem [shape: f32[1,64], index: 7, kind: input, shape index: {}]   ;;  %s1790_s8 = inlined_call_operand.vmem [shape: f32[1,64], index: 8, kind: input, shape index: {}]   ;;  %s1791_s9 = inlined_call_operand.vmem [shape: f32[1,64], index: 9, kind: input, shape index: {}]   ;;  %s1792_s10 = inlined_call_operand.vmem [shape: f32[64,64], index: 10, kind: input, shape index: {}]   ;;  %s1793_s11 = inlined_call_operand.vmem [shape: f32[1,64], index: 11, kind: input, shape index: {}]   ;;  %s1794_s12 = inlined_call_operand.vmem [shape: f32[1,64], index: 12, kind: input, shape index: {}]   ;;  %s1795_s13 = inlined_call_operand.vmem [shape: f32[1,64], index: 13, kind: input, shape index: {}]   ;;  %s1796_s14 = inlined_call_operand.vmem [shape: f32[64,64], index: 14, kind: input, shape index: {}]   ;;  %s1797_s15 = inlined_call_operand.vmem [shape: f32[1,64], index: 15, kind: input, shape index: {}]   ;;  %s1798_s16 = inlined_call_operand.vmem [shape: f32[1,64], index: 16, kind: input, shape index: {}]   ;;  %s1799_s17 = inlined_call_operand.vmem [shape: f32[1,64], index: 17, kind: input, shape index: {}]   ;;  %s1800_s18 = inlined_call_operand.vmem [shape: f32[1,64], index: 18, kind: input, shape index: {}]   ;;  %s1801_s19 = inlined_call_operand.<no memory space> [shape: f32[1,1], index: 19, kind: input, shape index: {}]   ;;  %s1802_s20 = inlined_call_operand.vmem [shape: f32[24,1], index: 20, kind: output, shape index: {}]  }
   0x1   :  { %1803 = sst [smem:[#allocation9_spill]] %s1782_s0  ;;  %v25_v0 = vstv %s1801_s19 }
   0x2   :  { %1804 = sst [smem:[#allocation10_spill]] %s1783_s1  ;;  %26 = vst [vmem:[#allocation2] sm:$0x1] %v25_v0 }
   0x3   :  { %1805 = sst [smem:[#allocation11_spill]] %s1784_s2 }
   0x4   :  { %1806 = sst [smem:[#allocation12_spill]] %s1785_s3 }
   0x5   :  { %1807 = sst [smem:[#allocation13_spill]] %s1786_s4 }
   0x6   :  { %27 = vsyncpa [#allocation4], 0 }
   0x7   :  { %28 = vsyncpa [#allocation6], 0  ;;  %s1521_s23 = smov 0  }
   0x8 LB: > { %s1808_s25 = sld [smem:[#allocation11_spill]]  ;;  %s1251_s26 = sadd.s32 4294967295, %s1405_s23   ;;  %s1405_s23 = sphi %s1521_s23, %s34_s23  }
   0x9   : > { %p1253_p0 = scmp.ge.s32.totalorder %s1405_s23, 1  ;;  %p495_p1 = scmp.lt.s32.totalorder %s1405_s23, 4 }
   0xa   : > { %p1286_p2 = scmp.eq.s32.totalorder %s1251_s26, 0  ;;  %s1407_s27 = smov [#allocation3]  }
   0xb   : > { %p1532_p3 = pnand %p1253_p0, %p495_p1  ;;  %s508_s28 = sshll.u32 %s1407_s27, 4  ;;  %s509_s28 = int_to_ptr.vmem [resolvable:$true] %s508_s28 }
   0xc   : > { %s1810_s30 = sld [smem:[#allocation13_spill]]  ;;  %s1408_s21 = smov [#allocation5]  }
   0xd   : > { %p1279_p4 = pneg %p1532_p3  ;;  %s525_s1 = sshll.u32 %s1408_s21, 4  ;;  %s526_s1 = int_to_ptr.vmem [resolvable:$true] %s525_s1 }
   0xe   : > { %s506_s3 = sshll.u32 %s1808_s25, 4  ;;  %s1409_s22 = smov 256   ;;  %s507_s3 = int_to_ptr.hbm [resolvable:$true] %s506_s3 }
   0xf   : > { %p1280_p5 = pnand %p1286_p2, %p1279_p4  ;;  %s1410_s24 = smov 16  }
  0x10   : > { %600 = sbr.rel (%p1532_p3) target bundleno = 1015 (0x3f7), region = 100 }
  0x11   : > { %1282 = dma.hbm_to_vmem [thread:$0]  (!%p1280_p5), %s507_s3, 4096, %s509_s28, [#allocation4], %s1409_s22, %s1409_s22, %s1410_s24  }
  0x12   : > { %s523_s0 = sshll.u32 %s1810_s30, 4  ;;  %s524_s0 = int_to_ptr.hbm [resolvable:$true] %s523_s0 }
  0x13   : > { %1285 = dma.hbm_to_vmem [thread:$0]  (!%p1280_p5), %s524_s0, 4096, %s526_s1, [#allocation6], %s1409_s22, %s1409_s22, %s1410_s24  }
  0x15   : > { %1396 = dma.done.wait (%p1286_p2), [#allocation4], 4096  }
  0x16   : > { %1398 = vsyncadd (%p1286_p2), [#allocation4], 4294963200 }
  0x17   : > { %1400 = dma.done.wait (%p1286_p2), [#allocation6], 4096  }
  0x18   : > { %1402 = vsyncadd (%p1286_p2), [#allocation6], 4294963200  ;;  %p666_p6 = scmp.lt.s32.totalorder %s1251_s26, 2  ;;  %s1811_s3 = sld [smem:[#allocation9_spill]]  ;;  %v1556_v2 = vld [vmem:[#allocation3 + $0xf0] sm:$0xff]  ;;  %v1558_v3 = vld [vmem:[#allocation3 + $0xf8] sm:$0xff] }
  0x19   : > { %s1411_s19 = smov 32   ;;  %723 = vmatpush.msra.mxu0 %v1556_v2  ;;  %v1562_v4 = vld [vmem:[#allocation3 + $0xe0] sm:$0xff]  ;;  %v1564_v5 = vld [vmem:[#allocation3 + $0xe8] sm:$0xff]  ;;  %743 = vmatpush.msra.mxu1 %v1558_v3  ;;  %v1567_v6 = vld [vmem:[#allocation3 + $0xd0] sm:$0xff]  ;;  %s1812_s30 = sld [smem:[#allocation12_spill]] }
  0x1a   : > { %s1815_s26 = smov (!%p666_p6, %s1251_s26), 2  ;;  %v712_v7 = vld [vmem:[#allocation3 + $0xd8] sm:$0xff]  ;;  %v709_v8 = vld [vmem:[#allocation3 + $0xc0] sm:$0xff]  ;;  %v710_v9 = vld [vmem:[#allocation3 + $0xc8] sm:$0xff]  ;;  %s1813_s24 = sld [smem:[#allocation10_spill]] }
  0x1b   : > { %s1548_s2 = sshll.u32 %s1815_s26, 3  ;;  %724 = vmatpush.msra.mxu0 %v1562_v4  ;;  %744 = vmatpush.msra.mxu1 %v1564_v5  ;;  %v707_v10 = vld [vmem:[#allocation3 + $0xb0] sm:$0xff]  ;;  %v708_v11 = vld [vmem:[#allocation3 + $0xb8] sm:$0xff]  ;;  %v705_v12 = vld [vmem:[#allocation3 + $0xa0] sm:$0xff]  ;;  %s1412_s26 = smov 64  }
  0x1c   : > { %v706_v13 = vld [vmem:[#allocation3 + $0xa8] sm:$0xff]  ;;  %v703_v14 = vld [vmem:[#allocation3 + $0x90] sm:$0xff]  ;;  %v704_v15 = vld [vmem:[#allocation3 + $0x98] sm:$0xff] }
  0x1d   : > { %725 = vmatpush.msra.mxu0 %v1567_v6  ;;  %745 = vmatpush.msra.mxu1 %v712_v7  ;;  %v701_v16 = vld [vmem:[#allocation3 + $0x80] sm:$0xff]  ;;  %v702_v17 = vld [vmem:[#allocation3 + $0x88] sm:$0xff]  ;;  %v699_v18 = vld [vmem:[#allocation3 + $0x70] sm:$0xff] }
  0x1e   : > { %s669_s28 = scalar_lea.vmem %s1811_s3, %s1548_s2  ;;  %v700_v19 = vld [vmem:[#allocation3 + $0x78] sm:$0xff]  ;;  %v697_v20 = vld [vmem:[#allocation3 + $0x60] sm:$0xff]  ;;  %v698_v21 = vld [vmem:[#allocation3 + $0x68] sm:$0xff] }
  0x1f   : > { %v1554_v1 = vld [vmem:[%s669_s28] sm:$0xff]  ;;  %726 = vmatpush.msra.mxu0 %v709_v8  ;;  %746 = vmatpush.msra.mxu1 %v710_v9  ;;  %v695_v22 = vld [vmem:[#allocation3 + $0x50] sm:$0xff]  ;;  %v694_v25 = vld [vmem:[#allocation3 + $0x48] sm:$0xff]  ;;  %s677_s28 = scalar_lea.vmem %s1802_s20, %s1548_s2 }
  0x20   : > { %679 = vrot.lane.b32.xlu0 %v1554_v1, %s1411_s19  ;;  %v696_v23 = vld [vmem:[#allocation3 + $0x58] sm:$0xff]  ;;  %v693_v24 = vld [vmem:[#allocation3 + $0x40] sm:$0xff]  ;;  %v691_v26 = vld [vmem:[#allocation3 + $0x30] sm:$0xff]  ;;  %s673_s25 = scalar_lea.vmem %s1813_s24, %s1548_s2 }
  0x21   : > { %727 = vmatpush.msra.mxu0 %v707_v10  ;;  %747 = vmatpush.msra.mxu1 %v708_v11  ;;  %v692_v27 = vld [vmem:[#allocation3 + $0x38] sm:$0xff]  ;;  %v689_v28 = vld [vmem:[#allocation3 + $0x20] sm:$0xff]  ;;  %v690_v29 = vld [vmem:[#allocation3 + $0x28] sm:$0xff] }
  0x22   : > { %v687_v30 = vld [vmem:[#allocation3 + $0x10] sm:$0xff]  ;;  %v688_v31 = vld [vmem:[#allocation3 + $0x18] sm:$0xff]  ;;  %v685_v32 = vld [vmem:[#allocation3] sm:$0xff] }
  0x23   : > { %728 = vmatpush.msra.mxu0 %v705_v12  ;;  %748 = vmatpush.msra.mxu1 %v706_v13  ;;  %v686_v33 = vld [vmem:[#allocation3 + $0x8] sm:$0xff]  ;;  %v1578_v34 = vld [vmem:[#allocation5 + $0xf0] sm:$0xff]  ;;  %v1580_v35 = vld [vmem:[#allocation5 + $0xf8] sm:$0xff] }
  0x24   : > { %v1582_v36 = vld [vmem:[#allocation5 + $0xe0] sm:$0xff]  ;;  %821 = vmatpush.msra.mxu2 %v1578_v34  ;;  %841 = vmatpush.msra.mxu3 %v1580_v35  ;;  %v1586_v37 = vld [vmem:[#allocation5 + $0xe8] sm:$0xff]  ;;  %v1588_v38 = vld [vmem:[#allocation5 + $0xd0] sm:$0xff] }
  0x25   : > { %729 = vmatpush.msra.mxu0 %v703_v14  ;;  %749 = vmatpush.msra.mxu1 %v704_v15  ;;  %v1590_v39 = vld [vmem:[#allocation5 + $0xd8] sm:$0xff]  ;;  %v1594_v40 = vld [vmem:[#allocation5 + $0xc0] sm:$0xff]  ;;  %v1596_v41 = vld [vmem:[#allocation5 + $0xc8] sm:$0xff] }
  0x26   : > { %822 = vmatpush.msra.mxu2 %v1582_v36  ;;  %842 = vmatpush.msra.mxu3 %v1586_v37  ;;  %v1600_v42 = vld [vmem:[#allocation5 + $0xb0] sm:$0xff]  ;;  %v1602_v43 = vld [vmem:[#allocation5 + $0xb8] sm:$0xff]  ;;  %v1606_v44 = vld [vmem:[#allocation5 + $0xa0] sm:$0xff] }
  0x27   : > { %730 = vmatpush.msra.mxu0 %v701_v16  ;;  %750 = vmatpush.msra.mxu1 %v702_v17  ;;  %v1608_v45 = vld [vmem:[#allocation5 + $0xa8] sm:$0xff]  ;;  %v801_v46 = vld [vmem:[#allocation5 + $0x90] sm:$0xff]  ;;  %v802_v47 = vld [vmem:[#allocation5 + $0x98] sm:$0xff] }
  0x28   : > { %682 = vrot.lane.b32.xlu0 %v1554_v1, %s1412_s26  ;;  %823 = vmatpush.msra.mxu2 %v1588_v38  ;;  %v799_v48 = vld [vmem:[#allocation5 + $0x80] sm:$0xff]  ;;  %v800_v49 = vld [vmem:[#allocation5 + $0x88] sm:$0xff]  ;;  %v797_v50 = vld [vmem:[#allocation5 + $0x70] sm:$0xff] }
  0x29   : > { %731 = vmatpush.msra.mxu0 %v699_v18  ;;  %751 = vmatpush.msra.mxu1 %v700_v19  ;;  %v798_v51 = vld [vmem:[#allocation5 + $0x78] sm:$0xff]  ;;  %v795_v52 = vld [vmem:[#allocation5 + $0x60] sm:$0xff]  ;;  %v796_v53 = vld [vmem:[#allocation5 + $0x68] sm:$0xff] }
  0x2a   : > { %843 = vmatpush.msra.mxu3 %v1590_v39  ;;  %824 = vmatpush.msra.mxu2 %v1594_v40  ;;  %v793_v54 = vld [vmem:[#allocation5 + $0x50] sm:$0xff]  ;;  %v794_v55 = vld [vmem:[#allocation5 + $0x58] sm:$0xff]  ;;  %v791_v60 = vld [vmem:[#allocation5 + $0x40] sm:$0xff] }
  0x2b   : > { %732 = vmatpush.msra.mxu0 %v697_v20  ;;  %752 = vmatpush.msra.mxu1 %v698_v21  ;;  %v792_v61 = vld [vmem:[#allocation5 + $0x48] sm:$0xff]  ;;  %v789_v62 = vld [vmem:[#allocation5 + $0x30] sm:$0xff]  ;;  %v790_v63 = vld [vmem:[#allocation5 + $0x38] sm:$0xff] }
  0x2c   : > { %844 = vmatpush.msra.mxu3 %v1596_v41  ;;  %825 = vmatpush.msra.mxu2 %v1600_v42  ;;  %v787_v0 = vld [vmem:[#allocation5 + $0x20] sm:$0xff] }
  0x2d   : > { %733 = vmatpush.msra.mxu0 %v695_v22  ;;  %753 = vmatpush.msra.mxu1 %v696_v23 }
  0x2e   : > { %845 = vmatpush.msra.mxu3 %v1602_v43  ;;  %826 = vmatpush.msra.mxu2 %v1606_v44 }
  0x2f   : > { %734 = vmatpush.msra.mxu0 %v693_v24  ;;  %754 = vmatpush.msra.mxu1 %v694_v25 }
  0x30   : > { %846 = vmatpush.msra.mxu3 %v1608_v45  ;;  %827 = vmatpush.msra.mxu2 %v801_v46 }
  0x31   : > { %735 = vmatpush.msra.mxu0 %v691_v26  ;;  %755 = vmatpush.msra.mxu1 %v692_v27 }
  0x32   : > { %847 = vmatpush.msra.mxu3 %v802_v47  ;;  %828 = vmatpush.msra.mxu2 %v799_v48 }
  0x33   : > { %736 = vmatpush.msra.mxu0 %v689_v28  ;;  %756 = vmatpush.msra.mxu1 %v690_v29 }
  0x34   : > { %848 = vmatpush.msra.mxu3 %v800_v49  ;;  %829 = vmatpush.msra.mxu2 %v797_v50 }
  0x35   : > { %737 = vmatpush.msra.mxu0 %v687_v30  ;;  %757 = vmatpush.msra.mxu1 %v688_v31 }
  0x36   : > { %849 = vmatpush.msra.mxu3 %v798_v51  ;;  %830 = vmatpush.msra.mxu2 %v795_v52 }
  0x37   : > { %738 = vmatpush.msra.mxu0 %v685_v32  ;;  %758 = vmatpush.msra.mxu1 %v686_v33 }
  0x38   : > { %850 = vmatpush.msra.mxu3 %v796_v53  ;;  %831 = vmatpush.msra.mxu2 %v793_v54 }
  0x39   : > { %881 = vmatpush.msrb.mxu0 %v1556_v2  ;;  %901 = vmatpush.msrb.mxu1 %v1558_v3  ;;  %v788_v2 = vld [vmem:[#allocation5 + $0x28] sm:$0xff]  ;;  %v785_v3 = vld [vmem:[#allocation5 + $0x10] sm:$0xff] }
  0x3a   : > { %851 = vmatpush.msra.mxu3 %v794_v55  ;;  %832 = vmatpush.msra.mxu2 %v791_v60 }
  0x3b   : > { %882 = vmatpush.msrb.mxu0 %v1562_v4  ;;  %902 = vmatpush.msrb.mxu1 %v1564_v5  ;;  %v786_v4 = vld [vmem:[#allocation5 + $0x18] sm:$0xff]  ;;  %v783_v5 = vld [vmem:[#allocation5] sm:$0xff] }
  0x3c   : > { %852 = vmatpush.msra.mxu3 %v792_v61  ;;  %833 = vmatpush.msra.mxu2 %v789_v62 }
  0x3d   : > { %883 = vmatpush.msrb.mxu0 %v1567_v6  ;;  %903 = vmatpush.msrb.mxu1 %v712_v7  ;;  %v1631_v6 = vld [vmem:[%s1812_s30] sm:$0x3] }
  0x3e   : > { %853 = vmatpush.msra.mxu3 %v790_v63  ;;  %834 = vmatpush.msra.mxu2 %v787_v0  ;;  %v720_v7 = vperm.slane %v1631_v6, 1 }
  0x3f   : > { %884 = vmatpush.msrb.mxu0 %v709_v8  ;;  %904 = vmatpush.msrb.mxu1 %v710_v9 }
  0x40   : > { %854 = vmatpush.msra.mxu3 %v788_v2  ;;  %835 = vmatpush.msra.mxu2 %v785_v3 }
  0x41   : > { %885 = vmatpush.msrb.mxu0 %v707_v10  ;;  %905 = vmatpush.msrb.mxu1 %v708_v11 }
  0x42   : > { %855 = vmatpush.msra.mxu3 %v786_v4  ;;  %836 = vmatpush.msra.mxu2 %v783_v5 }
  0x43   : > { %886 = vmatpush.msrb.mxu0 %v705_v12  ;;  %906 = vmatpush.msrb.mxu1 %v706_v13 }
  0x44   : > { %941 = vmatpush.msrb.mxu2 %v1578_v34 }
  0x45   : > { %887 = vmatpush.msrb.mxu0 %v703_v14  ;;  %907 = vmatpush.msrb.mxu1 %v704_v15 }
  0x46   : > { %942 = vmatpush.msrb.mxu2 %v1582_v36 }
  0x47   : > { %888 = vmatpush.msrb.mxu0 %v701_v16  ;;  %908 = vmatpush.msrb.mxu1 %v702_v17 }
  0x48   : > { %943 = vmatpush.msrb.mxu2 %v1588_v38 }
  0x49   : > { %889 = vmatpush.msrb.mxu0 %v699_v18  ;;  %909 = vmatpush.msrb.mxu1 %v700_v19 }
  0x4a   : > { %944 = vmatpush.msrb.mxu2 %v1594_v40 }
  0x4b   : > { %890 = vmatpush.msrb.mxu0 %v697_v20  ;;  %910 = vmatpush.msrb.mxu1 %v698_v21 }
  0x4c   : > { %945 = vmatpush.msrb.mxu2 %v1600_v42 }
  0x4d   : > { %891 = vmatpush.msrb.mxu0 %v695_v22  ;;  %911 = vmatpush.msrb.mxu1 %v696_v23  ;;  %v719_v23 = vperm.slane %v1631_v6, 0 }
  0x4e   : > { %946 = vmatpush.msrb.mxu2 %v1606_v44 }
  0x4f   : > { %892 = vmatpush.msrb.mxu0 %v693_v24  ;;  %912 = vmatpush.msrb.mxu1 %v694_v25 }
  0x50   : > { %947 = vmatpush.msrb.mxu2 %v801_v46  ;;  %v1017_v46 = vld [vmem:[%s1788_s6 + $0x70] sm:$0xff] }
  0x51   : > { %893 = vmatpush.msrb.mxu0 %v691_v26  ;;  %913 = vmatpush.msrb.mxu1 %v692_v27 }
  0x52   : > { %948 = vmatpush.msrb.mxu2 %v799_v48  ;;  %v1015_v48 = vld [vmem:[%s1788_s6 + $0x60] sm:$0xff] }
  0x53   : > { %894 = vmatpush.msrb.mxu0 %v689_v28  ;;  %914 = vmatpush.msrb.mxu1 %v690_v29 }
  0x54   : > { %949 = vmatpush.msrb.mxu2 %v797_v50  ;;  %v1013_v50 = vld [vmem:[%s1788_s6 + $0x50] sm:$0xff] }
  0x55   : > { %895 = vmatpush.msrb.mxu0 %v687_v30  ;;  %915 = vmatpush.msrb.mxu1 %v688_v31 }
  0x56   : > { %950 = vmatpush.msrb.mxu2 %v795_v52  ;;  %v1659_v52 = vld [vmem:[%s1787_s5] sm:$0x3] }
  0x57   : > { %896 = vmatpush.msrb.mxu0 %v685_v32  ;;  %916 = vmatpush.msrb.mxu1 %v686_v33 }
  0x58   : > { %951 = vmatpush.msrb.mxu2 %v793_v54  ;;  %v818_v54 = vperm.slane %v1659_v52, 1 }
  0x5a   : > { %952 = vmatpush.msrb.mxu2 %v791_v60  ;;  %v1007_v60 = vld [vmem:[%s1788_s6 + $0x20] sm:$0xff] }
  0x5c   : > { %953 = vmatpush.msrb.mxu2 %v789_v62  ;;  %v1006_v62 = vld [vmem:[%s1788_s6 + $0x18] sm:$0xff] }
  0x5e   : > { %954 = vmatpush.msrb.mxu2 %v787_v0  ;;  %v1004_v0 = vld [vmem:[%s1788_s6 + $0x8] sm:$0xff] }
  0x60   : > { %955 = vmatpush.msrb.mxu2 %v785_v3 }
  0x62   : > { %956 = vmatpush.msrb.mxu2 %v783_v5 }
  0x92   : > { %v680_v56 = vpop.permute.xlu0 %679 }
  0x93   : > { %v681_v57 = vmul.f32 %v680_v56, %v1554_v1  ;;  %v1009_v56 = vld [vmem:[%s1788_s6 + $0x30] sm:$0xff] }
  0x95   : > { %739 = vmatmul.f32.vlgmr.msra.gmra.mxu0 %v681_v57  ;;  %759 = vmatmul.f32.vlgmr.msra.gmra.mxu1 %v681_v57 }
  0x9a   : > { %v683_v58 = vpop.permute.xlu0 %682 }
  0x9b   : > { %v684_v59 = vmul.f32 %v683_v58, %v1554_v1  ;;  %v784_v1 = vld [vmem:[#allocation5 + $0x8] sm:$0xff] }
  0x9c   : > { %856 = vmatpush.msra.mxu3 %v784_v1 }
  0x9d   : > { %897 = vmatmul.f32.vlgmr.msrb.gmra.mxu0 %v684_v59  ;;  %917 = vmatmul.f32.vlgmr.msrb.gmra.mxu1 %v684_v59  ;;  %v1008_v59 = vld [vmem:[%s1788_s6 + $0x28] sm:$0xff] }
  0x9e   : > { %961 = vmatpush.msrb.mxu3 %v1580_v35 }
  0xa0   : > { %962 = vmatpush.msrb.mxu3 %v1586_v37 }
  0xa2   : > { %963 = vmatpush.msrb.mxu3 %v1590_v39 }
  0xa4   : > { %964 = vmatpush.msrb.mxu3 %v1596_v41 }
  0xa6   : > { %965 = vmatpush.msrb.mxu3 %v1602_v43 }
  0xa8   : > { %966 = vmatpush.msrb.mxu3 %v1608_v45  ;;  %v1018_v45 = vld [vmem:[%s1788_s6 + $0x78] sm:$0xff] }
  0xa9   : > { %1023 = vmatpush.msra.mxu0 %v1018_v45  ;;  %v1054_v45 = vld [vmem:[%s1792_s10] sm:$0xff] }
  0xaa   : > { %967 = vmatpush.msrb.mxu3 %v802_v47  ;;  %v1016_v47 = vld [vmem:[%s1788_s6 + $0x68] sm:$0xff] }
  0xab   : > { %1024 = vmatpush.msra.mxu0 %v1017_v46  ;;  %v1108_v46 = vld [vmem:[%s1796_s14 + $0x38] sm:$0xff] }
  0xac   : > { %968 = vmatpush.msrb.mxu3 %v800_v49  ;;  %v1014_v49 = vld [vmem:[%s1788_s6 + $0x58] sm:$0xff] }
  0xad   : > { %1025 = vmatpush.msra.mxu0 %v1016_v47  ;;  %v1107_v47 = vld [vmem:[%s1796_s14 + $0x30] sm:$0xff] }
  0xae   : > { %969 = vmatpush.msrb.mxu3 %v798_v51  ;;  %v1012_v51 = vld [vmem:[%s1788_s6 + $0x48] sm:$0xff] }
  0xaf   : > { %1026 = vmatpush.msra.mxu0 %v1015_v48  ;;  %v1106_v48 = vld [vmem:[%s1796_s14 + $0x28] sm:$0xff] }
  0xb0   : > { %970 = vmatpush.msrb.mxu3 %v796_v53  ;;  %v1011_v53 = vld [vmem:[%s1788_s6 + $0x40] sm:$0xff] }
  0xb1   : > { %1027 = vmatpush.msra.mxu0 %v1014_v49  ;;  %v1304_v49 = vld [vmem:[%s1789_s7] ss:$0 sm:$0xff] }
  0xb2   : > { %971 = vmatpush.msrb.mxu3 %v794_v55  ;;  %v1010_v55 = vld [vmem:[%s1788_s6 + $0x38] sm:$0xff] }
  0xb3   : > { %1028 = vmatpush.msra.mxu0 %v1013_v50  ;;  %v1305_v50 = vld [vmem:[%s1790_s8] ss:$0 sm:$0xff] }
  0xb4   : > { %972 = vmatpush.msrb.mxu3 %v792_v61 }
  0xb5   : > { %1029 = vmatpush.msra.mxu0 %v1012_v51 }
  0xb6   : > { %973 = vmatpush.msrb.mxu3 %v790_v63  ;;  %v1005_v63 = vld [vmem:[%s1788_s6 + $0x10] sm:$0xff] }
  0xb7   : > { %1030 = vmatpush.msra.mxu0 %v1011_v53  ;;  %v1306_v53 = vld [vmem:[%s1791_s9] ss:$0 sm:$0xff] }
  0xb8   : > { %974 = vmatpush.msrb.mxu3 %v788_v2 }
  0xb9   : > { %1031 = vmatpush.msra.mxu0 %v1010_v55 }
  0xba   : > { %975 = vmatpush.msrb.mxu3 %v786_v4  ;;  %v1003_v4 = vld [vmem:[%s1788_s6] sm:$0xff] }
  0xbb   : > { %1032 = vmatpush.msra.mxu0 %v1009_v56 }
  0xbc   : > { %976 = vmatpush.msrb.mxu3 %v784_v1 }
  0xbd   : > { %1033 = vmatpush.msra.mxu0 %v1008_v59  ;;  %v1103_v59 = vld [vmem:[%s1796_s14 + $0x10] sm:$0xff] }
  0xbf   : > { %1034 = vmatpush.msra.mxu0 %v1007_v60  ;;  %v1102_v60 = vld [vmem:[%s1796_s14 + $0x8] sm:$0xff] }
  0xc1   : > { %1035 = vmatpush.msra.mxu0 %v1006_v62  ;;  %v1307_v62 = vld [vmem:[%s1793_s11] ss:$0 sm:$0xff] }
  0xc3   : > { %1036 = vmatpush.msra.mxu0 %v1005_v63  ;;  %v1308_v63 = vld [vmem:[%s1794_s12] ss:$0 sm:$0xff] }
  0xc5   : > { %1037 = vmatpush.msra.mxu0 %v1004_v0 }
  0xc7   : > { %1038 = vmatpush.msra.mxu0 %v1003_v4 }
 0x112   : > { %v760_v8 = vpop.f32.mrf.mxu1  ;;  %v740_v21 = vpop.f32.mrf.mxu0 }
 0x113   : > { %v761_v9 = vadd.f32 %v760_v8, %v720_v7  ;;  %v741_v29 = vadd.f32 %v740_v21, %v719_v23  ;;  %v1060_v8 = vld [vmem:[%s1792_s10 + $0x30] sm:$0xff] }
 0x115   : > { %v1263_v10 = vmul.f32 -1.442695, %v761_v9  ;;  %v1059_v9 = vld [vmem:[%s1792_s10 + $0x28] sm:$0xff] }
 0x117   : > { %1315 = vpow2.f32 %v1263_v10 }
 0x11a   : > { %v918_v11 = vpop.f32.mrf.mxu1  ;;  %v898_v38 = vpop.f32.mrf.mxu0 }
 0x11b   : > { %v919_v12 = vadd.f32 %v918_v11, %v720_v7  ;;  %v899_v41 = vadd.f32 %v898_v38, %v719_v23  ;;  %v1061_v7 = vld [vmem:[%s1792_s10 + $0x38] sm:$0xff] }
 0x11c   : > { %1078 = vmatpush.msra.mxu1 %v1061_v7  ;;  %v1311_v7 = vld [vmem:[%s1798_s16] ss:$0 sm:$0xff] }
 0x11d   : > { %v1316_v13 = vpop.eup %1315  ;;  %v1265_v14 = vmul.f32 -1.442695, %v919_v12 }
 0x11e   : > { %v766_v15 = vadd.f32 1.0, %v1316_v13  ;;  %1079 = vmatpush.msra.mxu1 %v1060_v8 }
 0x11f   : > { %1317 = vpow2.f32 %v1265_v14 }
 0x120   : > { %1319 = vrcp.f32 %v766_v15  ;;  %v778_v22 = vand.u32 2147483648, %v766_v15  ;;  %v776_v25 = vand.u32 2147483647, %v766_v15  ;;  %vm772_vm1 = vweird.f32 %v766_v15  ;;  %1080 = vmatpush.msra.mxu1 %v1059_v9 }
 0x122   : > { %v779_v28 = vor.u32 1.1754944e-38, %v778_v22  ;;  %vm777_vm3 = vcmp.eq.f32.partialorder %v776_v25, 8.507059e+37 }
 0x125   : > { %v1318_v16 = vpop.eup %1317 }
 0x126   : > { %v1320_v17 = vpop.eup %1319  ;;  %v924_v18 = vadd.f32 1.0, %v1318_v16 }
 0x127   : > { %v768_v19 = vmul.f32 %v1320_v17, %v766_v15  ;;  %vm773_vm0 = vweird.f32 %v1320_v17 }
 0x128   : > { %1321 = vrcp.f32 %v924_v18  ;;  %vm774_vm2 = vmor %vm772_vm1, %vm773_vm0  ;;  %v936_v35 = vand.u32 2147483648, %v924_v18  ;;  %v934_v37 = vand.u32 2147483647, %v924_v18  ;;  %vm930_vm5 = vweird.f32 %v924_v18 }
 0x129   : > { %v769_v20 = vsub.f32 1.0, %v768_v19  ;;  %vm1066_vm0 = vcmask 523264   ;;  %vm1162_vm1 = vcmask 7168  }
 0x12a   : > { %v937_v40 = vor.u32 1.1754944e-38, %v936_v35  ;;  %vm935_vm7 = vcmp.eq.f32.partialorder %v934_v37, 8.507059e+37 }
 0x12b   : > { %v770_v24 = vmul.f32 %v1320_v17, %v769_v20 }
 0x12d   : > { %v771_v26 = vadd.f32 %v1320_v17, %v770_v24 }
 0x12e   : > { %v1322_v27 = vpop.eup %1321 }
 0x12f   : > { %v926_v30 = vmul.f32 %v1322_v27, %v924_v18  ;;  %v775_v31 = vsel %vm774_vm2, %v1320_v17, %v771_v26  ;;  %vm931_vm4 = vweird.f32 %v1322_v27 }
 0x130   : > { %v780_v32 = vsel %vm777_vm3, %v779_v28, %v775_v31  ;;  %vm932_vm6 = vmor %vm930_vm5, %vm931_vm4 }
 0x131   : > { %v782_v33 = vmul.f32 %v780_v32, %v741_v29  ;;  %v927_v34 = vsub.f32 1.0, %v926_v30 }
 0x133   : > { %837 = vmatmul.f32.vlgmr.msra.gmra.mxu2 %v782_v33  ;;  %857 = vmatmul.f32.vlgmr.msra.gmra.mxu3 %v782_v33  ;;  %v928_v36 = vmul.f32 %v1322_v27, %v927_v34 }
 0x134   : > { %1124 = vmatpush.msra.mxu2 %v1108_v46 }
 0x135   : > { %v929_v39 = vadd.f32 %v1322_v27, %v928_v36 }
 0x136   : > { %1125 = vmatpush.msra.mxu2 %v1107_v47 }
 0x137   : > { %v933_v42 = vsel %vm932_vm6, %v1322_v27, %v929_v39  ;;  %v817_v27 = vperm.slane %v1659_v52, 0 }
 0x138   : > { %v938_v43 = vsel %vm935_vm7, %v937_v40, %v933_v42  ;;  %v1057_v42 = vld [vmem:[%s1792_s10 + $0x18] sm:$0xff]  ;;  %1126 = vmatpush.msra.mxu2 %v1106_v48 }
 0x139   : > { %v940_v44 = vmul.f32 %v938_v43, %v899_v41  ;;  %v1058_v41 = vld [vmem:[%s1792_s10 + $0x20] sm:$0xff]  ;;  %v1056_v43 = vld [vmem:[%s1792_s10 + $0x10] sm:$0xff] }
 0x13a   : > { %1081 = vmatpush.msra.mxu1 %v1058_v41 }
 0x13b   : > { %957 = vmatmul.f32.vlgmr.msrb.gmra.mxu2 %v940_v44  ;;  %977 = vmatmul.f32.vlgmr.msrb.gmra.mxu3 %v940_v44  ;;  %v1055_v44 = vld [vmem:[%s1792_s10 + $0x8] sm:$0xff] }
 0x13c   : > { %1082 = vmatpush.msra.mxu1 %v1057_v42 }
 0x13e   : > { %1083 = vmatpush.msra.mxu1 %v1056_v43 }
 0x140   : > { %1084 = vmatpush.msra.mxu1 %v1055_v44 }
 0x142   : > { %1085 = vmatpush.msra.mxu1 %v1054_v45 }
 0x1b6   : > { %v858_v57 = vpop.f32.mrf.mxu3  ;;  %v838_v15 = vpop.f32.mrf.mxu2 }
 0x1b7   : > { %v859_v58 = vadd.f32 %v858_v57, %v818_v54  ;;  %v839_v36 = vadd.f32 %v838_v15, %v817_v27  ;;  %v1105_v57 = vld [vmem:[%s1796_s14 + $0x20] sm:$0xff] }
 0x1b8   : > { %1127 = vmatpush.msra.mxu2 %v1105_v57 }
 0x1b9   : > { %v1264_v61 = vmul.f32 -1.442695, %v859_v58  ;;  %v1104_v58 = vld [vmem:[%s1796_s14 + $0x18] sm:$0xff] }
 0x1ba   : > { %1128 = vmatpush.msra.mxu2 %v1104_v58 }
 0x1bb   : > { %1323 = vpow2.f32 %v1264_v61  ;;  %v1101_v61 = vld [vmem:[%s1796_s14] sm:$0xff] }
 0x1bc   : > { %1129 = vmatpush.msra.mxu2 %v1103_v59 }
 0x1be   : > { %v978_v2 = vpop.f32.mrf.mxu3  ;;  %v958_v26 = vpop.f32.mrf.mxu2  ;;  %1130 = vmatpush.msra.mxu2 %v1102_v60 }
 0x1bf   : > { %v979_v3 = vadd.f32 %v978_v2, %v818_v54  ;;  %v959_v32 = vadd.f32 %v958_v26, %v817_v27 }
 0x1c0   : > { %1131 = vmatpush.msra.mxu2 %v1101_v61 }
 0x1c1   : > { %v1324_v5 = vpop.eup %1323  ;;  %v1266_v1 = vmul.f32 -1.442695, %v979_v3  ;;  %v1309_v3 = vld [vmem:[%s1795_s13] ss:$0 sm:$0xff] }
 0x1c2   : > { %v864_v6 = vadd.f32 1.0, %v1324_v5 }
 0x1c3   : > { %1325 = vpow2.f32 %v1266_v1 }
 0x1c4   : > { %1327 = vrcp.f32 %v864_v6  ;;  %vm870_vm9 = vweird.f32 %v864_v6  ;;  %v876_v22 = vand.u32 2147483648, %v864_v6  ;;  %v874_v24 = vand.u32 2147483647, %v864_v6 }
 0x1c6   : > { %v877_v30 = vor.u32 1.1754944e-38, %v876_v22  ;;  %vm875_vm14 = vcmp.eq.f32.partialorder %v874_v24, 8.507059e+37 }
 0x1c9   : > { %v1326_v10 = vpop.eup %1325 }
 0x1ca   : > { %v1328_v11 = vpop.eup %1327  ;;  %v984_v12 = vadd.f32 1.0, %v1326_v10  ;;  %v1312_v10 = vld [vmem:[%s1799_s17] ss:$0 sm:$0xff] }
 0x1cb   : > { %v866_v13 = vmul.f32 %v1328_v11, %v864_v6  ;;  %vm871_vm8 = vweird.f32 %v1328_v11  ;;  %v1310_v6 = vld [vmem:[%s1797_s15] ss:$0 sm:$0xff] }
 0x1cc   : > { %1329 = vrcp.f32 %v984_v12  ;;  %v996_v21 = vand.u32 2147483648, %v984_v12  ;;  %v994_v25 = vand.u32 2147483647, %v984_v12  ;;  %vm872_vm11 = vmor %vm870_vm9, %vm871_vm8  ;;  %vm990_vm12 = vweird.f32 %v984_v12 }
 0x1cd   : > { %v867_v14 = vsub.f32 1.0, %v866_v13  ;;  %v1313_v13 = vld [vmem:[%s1800_s18] ss:$0 sm:$0xff] }
 0x1ce   : > { %v997_v31 = vor.u32 1.1754944e-38, %v996_v21  ;;  %vm995_vm15 = vcmp.eq.f32.partialorder %v994_v25, 8.507059e+37 }
 0x1cf   : > { %v868_v16 = vmul.f32 %v1328_v11, %v867_v14 }
 0x1d1   : > { %v869_v20 = vadd.f32 %v1328_v11, %v868_v16 }
 0x1d2   : > { %v1330_v17 = vpop.eup %1329 }
 0x1d3   : > { %v986_v18 = vmul.f32 %v1330_v17, %v984_v12  ;;  %vm991_vm10 = vweird.f32 %v1330_v17  ;;  %v873_v28 = vsel %vm872_vm11, %v1328_v11, %v869_v20 }
 0x1d4   : > { %vm992_vm13 = vmor %vm990_vm12, %vm991_vm10  ;;  %v878_v34 = vsel %vm875_vm14, %v877_v30, %v873_v28 }
 0x1d5   : > { %v987_v19 = vsub.f32 1.0, %v986_v18  ;;  %v880_v38 = vmul.f32 %v878_v34, %v839_v36  ;;  %v1314_v18 = vld [vmem:[#allocation2] ss:$0 sm:$0xff] }
 0x1d7   : > { %v988_v23 = vmul.f32 %v1330_v17, %v987_v19 }
 0x1d9   : > { %v989_v29 = vadd.f32 %v1330_v17, %v988_v23 }
 0x1db   : > { %v993_v33 = vsel %vm992_vm13, %v1330_v17, %v989_v29  ;;  %v1155_v17 = vld [vmem:[%s673_s25] sm:$0xff] }
 0x1dc   : > { %v998_v35 = vsel %vm995_vm15, %v997_v31, %v993_v33 }
 0x1dd   : > { %v1000_v37 = vmul.f32 %v998_v35, %v959_v32 }
 0x1df   : > { %v1001_v39 = vmul.f32 0.5, %v1000_v37 }
 0x1e1   : > { %v1002_v40 = vadd.f32 %v1001_v39, %v880_v38 }
 0x1e3   : > { %1039 = vmatmul.f32.vlgmr.msra.gmra.mxu0 %v1002_v40 }
 0x260   : > { %v1040_v51 = vpop.f32.mrf.mxu0 }
 0x261   : > { %v1041_v52 = vadd.f32 %v1304_v49, %v1040_v51 }
 0x263   : > { %v1047_v54 = vmul.f32 %v1305_v50, %v1041_v52 }
 0x265   : > { %v1052_v55 = vadd.f32 %v1306_v53, %v1047_v54 }
 0x267   : > { %v1053_v56 = vmax.f32 %v1052_v55, 0.0 }
 0x269   : > { %1267 = vmatmul.msk.f32.vlgmr.msra.gmra.mxu1 %vm1066_vm0, %v1053_v56 }
 0x2e6   : > { %v1087_v0 = vpop.f32.mrf.mxu1 }
 0x2e7   : > { %v1088_v2 = vadd.f32 %v1307_v62, %v1087_v0 }
 0x2e9   : > { %v1094_v4 = vmul.f32 %v1308_v63, %v1088_v2 }
 0x2eb   : > { %v1099_v5 = vadd.f32 %v1309_v3, %v1094_v4 }
 0x2ed   : > { %v1100_v1 = vmax.f32 %v1099_v5, 0.0 }
 0x2ef   : > { %1268 = vmatmul.msk.f32.vlgmr.msra.gmra.mxu2 %vm1066_vm0, %v1100_v1 }
 0x372   : > { %v1133_v8 = vpop.f32.mrf.mxu2 }
 0x373   : > { %v1134_v9 = vadd.f32 %v1310_v6, %v1133_v8 }
 0x375   : > { %v1140_v11 = vmul.f32 %v1311_v7, %v1134_v9 }
 0x377   : > { %v1145_v12 = vadd.f32 %v1312_v10, %v1140_v11 }
 0x379   : > { %v1146_v14 = vmax.f32 %v1145_v12, 0.0 }
 0x37b   : > { %v1151_v15 = vmul.f32 %v1313_v13, %v1146_v14 }
 0x37d   : > { %v1152_v16 = vsel %vm1066_vm0, %v1151_v15, 0.0 }
 0x37e   : > { %1153 = vadd.xlane.f32.xlu1 %v1152_v16 }
 0x3f1   : > { %v1154_v19 = vpop.xlane.xlu1 %1153 }
 0x3f2   : > { %v1156_v20 = vadd.f32 %v1155_v17, %v1154_v19 }
 0x3f4   : > { %v1161_v21 = vadd.f32 %v1314_v18, %v1156_v20 }
 0x3f6   : > { %1163 = vst.msk [vmem:[%s677_s28] sm:$0xff] %vm1162_vm1, %v1161_v21 }
 0x3f7 PF: > { %s34_s23 = sadd.s32 1, %s1405_s23  }
 0x3f8   : > { %p31_p7 = scmp.ge.s32.totalorder %s34_s23, 5  }
 0x3fa   :  { %33 = sbr.rel (!%p31_p7) target bundleno = 8 (0x8), region = 142 }
 0x3ff   :  { %1183 = vsyncpa [#allocation4], 1 }
 0x400   :  { %1185 = vsyncpa [#allocation4 + $0x1], 1 }
 0x401   :  { %1186 = vsyncpa [#allocation6], 1 }

</bundles_post_ra>
